<compile_context>
chip_gen: v5e
topology: v5e:2x2
jax: 0.10.0
libtpu: 0.0.40
codegen_flags: <defaults>
</compile_context>

<pallas_src>
import functools

import jax
import jax.numpy as jnp
from jax.experimental import pallas as pl
from jax.experimental.pallas import tpu as pltpu


def _round_up(x: int, m: int) -> int:
    return (x + m - 1) // m * m


def _num_tensorcores() -> int:
    """Best-effort TensorCores-per-chip (2 on v7x, 1 on v5e/v6e); safe fallback = 1."""
    try:
        info = pltpu.get_tpu_info()
        for name in ("num_cores", "num_tensorcores", "tensorcore_count", "cores_per_chip"):
            v = getattr(info, name, None)
            if isinstance(v, int) and v > 0:
                return v
    except Exception:
        pass
    try:
        v = getattr(jax.devices()[0], "num_cores", None)
        if isinstance(v, int) and v > 0:
            return v
    except Exception:
        pass
    return 1


def _causal_conv1d_kernel(x_ref, w_ref, b_ref, o_ref, *scratch, dilation,
                          kernel_size, pad, fold_taps):
    """Grid = (B, Cout_tiles, T_tiles); time is innermost and 'arbitrary'.

    x_ref : (1, C_in_p, T_TILE)    input tile, *input* dtype (cast happens here)
    w_ref : (C_out_t, K*C_in_p) if fold_taps else (K, C_out_t, C_in_p), compute dtype
    b_ref : (C_out_t, 1)           bias, f32
    o_ref : (1, C_out_t, T_TILE)   output tile
    scratch (only when pad > 0):
      xext_ref  : (C_in_p, pad + T_TILE)   carried halo + current tile (compute dtype)
      stage_ref : (K*C_in_p, T_TILE)       only for the folded small-C_in path
    """
    t_tile = o_ref.shape[2]
    c_in_p = x_ref.shape[1]
    cdt = w_ref.dtype

    if pad == 0:
        # 1x1 conv: no halo, no carry — dot straight from the input tile.
        x_now = x_ref[0].astype(cdt)
        w2 = w_ref[...] if fold_taps else w_ref[0]
        acc = jnp.dot(w2, x_now, preferred_element_type=jnp.float32)
        o_ref[0] = (acc + b_ref[...]).astype(o_ref.dtype)
        return

    xext_ref = scratch[0]
    t_idx = pl.program_id(2)

    # First time tile of every (batch, cout-tile): halo = zeros.  This IS the causal
    # ConstantPad1d left pad, realized purely in VMEM (never materialized in HBM).
    @pl.when(t_idx == 0)
    def _():
        xext_ref[:, :pad] = jnp.zeros((c_in_p, pad), dtype=xext_ref.dtype)

    # Stage the current tile right after the carried halo.  The compute-dtype cast
    # happens here, so x is never rewritten/cast in HBM by the wrapper.
    xext_ref[:, pad:] = x_ref[0].astype(xext_ref.dtype)

    if fold_taps:
        # Small-C_in fallback: fold the K taps into ONE MXU matmul whose contraction
        # dim is K*C_in_p (the MXU pads the contraction internally either way, so K
        # tiny dots would just waste pushes).
        stage_ref = scratch[1]
        for kk in range(kernel_size):
            stage_ref[kk * c_in_p:(kk + 1) * c_in_p, :] = \
                xext_ref[:, kk * dilation:kk * dilation + t_tile]
        acc = jnp.dot(w_ref[...], stage_ref[...], preferred_element_type=jnp.float32)
    else:
        # MXU-sized C_in: accumulate K dots straight from the halo buffer — no staging
        # copies (no extra vst/vld traffic) and no staging scratch VMEM.
        acc = jnp.dot(w_ref[0], xext_ref[:, 0:t_tile],
                      preferred_element_type=jnp.float32)
        for kk in range(1, kernel_size):
            acc = acc + jnp.dot(w_ref[kk],
                                xext_ref[:, kk * dilation:kk * dilation + t_tile],
                                preferred_element_type=jnp.float32)

    o_ref[0] = (acc + b_ref[...]).astype(o_ref.dtype)

    # Carry the last `pad` input columns for the next time tile.  Value-semantics
    # load-then-store keeps this correct even when pad > t_tile (overlapping ranges).
    @pl.when(t_idx + 1 < pl.num_programs(2))
    def _():
        xext_ref[:, :pad] = xext_ref[:, t_tile:t_tile + pad]


def causal_conv1d(x, weight, bias, *, dilation: int = 1, t_tile=None,
                  compute_dtype=None, n_co=None):
    """x: (B, C_in, T); weight: (C_out, C_in, K); bias: (C_out,) -> (B, C_out, T)."""
    b, c_in, t = x.shape
    c_out, c_in_w, k = weight.shape
    assert c_in_w == c_in
    pad = (k - 1) * dilation
    out_dtype = x.dtype
    cdt = jnp.dtype(compute_dtype) if compute_dtype is not None else jnp.dtype(x.dtype)

    # Sublane packing follows the compute dtype (8 f32 / 16 bf16 / 32 int8).
    pack = {1: 32, 2: 16, 4: 8}.get(cdt.itemsize, 8)
    c_in_p = _round_up(c_in, pack)
    c_out_p = _round_up(c_out, pack)

    # Small C_in -> folded single-matmul path; MXU-sized C_in -> per-tap dots.
    fold_taps = c_in_p < 128

    # Output-channel split keeps both v7x TensorCores busy for B == 1 streaming
    # inference (no-op on 1-TC chips; each extra tile re-reads x once from HBM).
    if n_co is None:
        n_co = 2 if (b == 1 and _num_tensorcores() >= 2 and c_out_p >= 2 * pack) else 1
    co_tile = _round_up((c_out_p + n_co - 1) // n_co, pack)
    c_out_pp = n_co * co_tile

    # ---- VMEM budget & time-tile selection ----------------------------------
    try:
        vmem_cap = int(pltpu.get_tpu_info().vmem_capacity_bytes)
    except Exception:
        vmem_cap = 64 << 20            # conservative: v7x has 64 MiB / TensorCore
    budget = vmem_cap // 2             # leave room for Mosaic internal scratch / spills

    in_item = jnp.dtype(x.dtype).itemsize
    out_item = jnp.dtype(out_dtype).itemsize

    def _vmem_estimate(tt: int) -> int:
        x_buf = 2 * c_in_p * tt * in_item                    # double-buffered input tile
        o_buf = 2 * co_tile * tt * out_item                  # double-buffered output tile
        w_buf = 2 * k * co_tile * c_in_p * cdt.itemsize      # constant block, still 2 bufs
        b_buf = 2 * co_tile * 128 * 4                        # bias (lane-padded), 2 bufs
        xext = c_in_p * (pad + tt) * cdt.itemsize if pad else 0
        stage = k * c_in_p * tt * cdt.itemsize if (fold_taps and pad) else 0
        acc = 2 * co_tile * tt * 4                           # f32 matmul result + bias/cast temps
        return x_buf + o_buf + w_buf + b_buf + xext + stage + acc

    if t_tile is None:
        # Scale UP with small channel counts: target >= ~1 MiB of x per grid step so
        # the ~0.35 us per-step overhead is amortized; the VMEM loop below is the cap.
        t_tile = (1 << 20) // max(1, c_in_p * in_item)
        t_tile = min(max(t_tile, 512), 16384)
    t_tile = max(128, _round_up(int(t_tile), 128))
    t_tile = min(t_tile, _round_up(t, 128))
    while t_tile > 128 and _vmem_estimate(t_tile) > budget:
        t_tile -= 128

    n_t = (t + t_tile - 1) // t_tile
    t_p = n_t * t_tile

    # ---- inputs: pad only when shapes don't already align --------------------
    # The causal *left* pad never touches HBM (handled by the in-kernel halo carry).
    # TODO(synk): handle the time tail with a masked epilogue tile so large unaligned-T
    # inputs are never rewritten in HBM either.
    if c_in_p != c_in or t_p != t:
        x_in = jnp.pad(x, ((0, 0), (0, c_in_p - c_in), (0, t_p - t)))
    else:
        x_in = x        # zero-copy; compute-dtype cast happens inside the kernel

    w_p = jnp.pad(weight, ((0, c_out_pp - c_out), (0, c_in_p - c_in), (0, 0))).astype(cdt)
    if fold_taps:
        # (C_out_pp, K*C_in_p) with w2[o, k*C_in_p + c] = weight[o, c, k].
        w_arg = jnp.transpose(w_p, (0, 2, 1)).reshape(c_out_pp, k * c_in_p)
        w_spec = pl.BlockSpec((co_tile, k * c_in_p), lambda bi, ci, ti: (ci, 0))
    else:
        # (K, C_out_pp, C_in_p): one tap per leading index.
        w_arg = jnp.transpose(w_p, (2, 0, 1))
        w_spec = pl.BlockSpec((k, co_tile, c_in_p), lambda bi, ci, ti: (0, ci, 0))
    b_arg = jnp.pad(bias, (0, c_out_pp - c_out)).reshape(c_out_pp, 1).astype(jnp.float32)

    scratch = []
    if pad > 0:
        scratch.append(pltpu.VMEM((c_in_p, pad + t_tile), cdt))     # halo + current tile
        if fold_taps:
            scratch.append(pltpu.VMEM((k * c_in_p, t_tile), cdt))   # tap-stacked RHS

    kernel = functools.partial(_causal_conv1d_kernel, dilation=dilation,
                               kernel_size=k, pad=pad, fold_taps=fold_taps)

    vmem_limit = int(min(vmem_cap, max(_vmem_estimate(t_tile) + (8 << 20), 32 << 20)))

    y_p = pl.pallas_call(
        kernel,
        out_shape=jax.ShapeDtypeStruct((b, c_out_pp, t_p), out_dtype),
        grid_spec=pltpu.PrefetchScalarGridSpec(
            num_scalar_prefetch=0,
            grid=(b, n_co, n_t),
            in_specs=[
                pl.BlockSpec((1, c_in_p, t_tile), lambda bi, ci, ti: (bi, 0, ti)),
                w_spec,
                pl.BlockSpec((co_tile, 1), lambda bi, ci, ti: (ci, 0)),
            ],
            out_specs=pl.BlockSpec((1, co_tile, t_tile), lambda bi, ci, ti: (bi, ci, ti)),
            scratch_shapes=scratch,
        ),
        compiler_params=pltpu.CompilerParams(
            # Batch and C_out tiles are independent ('parallel', megacore-shardable).
            # The time axis carries the halo scratch, so it MUST stay the innermost
            # 'arbitrary' axis (sequential, in order, per core) — do not reorder.
            dimension_semantics=("parallel", "parallel", "arbitrary"),
            vmem_limit_bytes=vmem_limit,
        ),
    )(x_in, w_arg, b_arg)

    if c_out_pp != c_out or t_p != t:
        return y_p[:, :c_out, :t]
    return y_p


def _reference(x, weight, bias, dilation):
    """Pure-JAX reference matching the PyTorch module (pad both sides, conv, slice)."""
    k = weight.shape[2]
    pad = (k - 1) * dilation
    x_pad = jnp.pad(x, ((0, 0), (0, 0), (pad, pad)))
    y = jax.lax.conv_general_dilated(
        x_pad, weight, window_strides=(1,), padding="VALID",
        rhs_dilation=(dilation,),
        dimension_numbers=("NCH", "OIH", "NCH"))
    y = y + bias.reshape(1, -1, 1)
    return y[:, :, :x.shape[2]]


if __name__ == "__main__":
    def _check(B, C_IN, C_OUT, T, K, DIL, key, atol, rtol, **kw):
        kx, kw_, kb = jax.random.split(key, 3)
        x = jax.random.normal(kx, (B, C_IN, T), dtype=jnp.float32)
        w = jax.random.normal(kw_, (C_OUT, C_IN, K), dtype=jnp.float32) / jnp.sqrt(C_IN * K)
        bias = jax.random.normal(kb, (C_OUT,), dtype=jnp.float32) * 0.1
        y = jax.block_until_ready(causal_conv1d(x, w, bias, dilation=DIL, **kw))
        y_ref = _reference(x, w, bias, DIL)
        assert y.shape == (B, C_OUT, T), (y.shape, (B, C_OUT, T))
        assert jnp.allclose(y, y_ref, atol=atol, rtol=rtol), "mismatch vs reference"

    k1, k2, k3 = jax.random.split(jax.random.PRNGKey(0), 3)

    # 1) Spec-sized smoke test (small C_in -> folded-matmul path, single time tile).
    _check(2, 4, 6, 16, 3, 2, k1, 1e-5, 1e-5)

    # 2) Multi time-tile halo carry with (K-1)*dilation > t_tile (overlapping carry,
    #    per-batch halo re-initialization) — covers the review's correctness concern.
    _check(2, 8, 8, 300, 3, 80, k2, 1e-4, 1e-4, t_tile=128)

    # 3) MXU-sized channels: per-tap dot path, bf16 compute-dtype cast in-kernel,
    #    fully aligned input (no wrapper pad, no output slice).
    _check(1, 128, 128, 512, 3, 1, k3, 1e-1, 1e-1, t_tile=256,
           compute_dtype=jnp.bfloat16)

    print("KERNEL_OK")
</pallas_src>

<mosaic_0001>
module attributes {stable_mosaic.version = 11 : i64} {
  func.func @_causal_conv1d_kernel(%arg0: i32, %arg1: i32, %arg2: i32, %arg3: memref<1x8x128xf32, #tpu.memory_space<vmem>>, %arg4: memref<8x24xf32, #tpu.memory_space<vmem>>, %arg5: memref<8x1xf32, #tpu.memory_space<vmem>>, %arg6: memref<1x8x128xf32, #tpu.memory_space<vmem>>, %arg7: memref<8x132xf32, #tpu.memory_space<vmem>>, %arg8: memref<24x128xf32, #tpu.memory_space<vmem>>) attributes {dimension_semantics = [#tpu.dimension_semantics<parallel>, #tpu.dimension_semantics<parallel>, #tpu.dimension_semantics<arbitrary>], iteration_bounds = array<i64: 2, 1, 1>, scalar_prefetch = 0 : i64, scratch_operands = 2 : i64, tpu.core_type = #tpu.core_type<tc>, window_params = [{transform_indices = @transform_0, window_bounds = array<i64: 1, 8, 128>}, {transform_indices = @transform_1, window_bounds = array<i64: 8, 24>}, {transform_indices = @transform_2, window_bounds = array<i64: 8, 1>}, {transform_indices = @transform_3, window_bounds = array<i64: 1, 8, 128>}]} {
    %c0_i32 = arith.constant 0 : i32
    %0 = arith.cmpi eq, %arg2, %c0_i32 : i32
    %1 = arith.extui %0 : i1 to i32
    %c0_i32_0 = arith.constant 0 : i32
    %2 = arith.cmpi ne, %1, %c0_i32_0 : i32
    scf.if %2 {
      %cst_24 = arith.constant 0.000000e+00 : f32
      %25 = vector.broadcast %cst_24 : f32 to vector<8x4xf32>
      %c0_25 = arith.constant 0 : index
      %c0_26 = arith.constant 0 : index
      %26 = vector.load %arg7[%c0_25, %c0_26] : memref<8x132xf32, #tpu.memory_space<vmem>>, vector<8x4xf32>
      tpu.vector_store %arg7[%c0_25, %c0_26], %25 {strides = array<i32>} : memref<8x132xf32, #tpu.memory_space<vmem>>, vector<8x4xf32>,
    } else {
    }
    %c0 = arith.constant 0 : index
    %c0_1 = arith.constant 0 : index
    %c0_2 = arith.constant 0 : index
    %3 = vector.load %arg3[%c0, %c0_1, %c0_2] : memref<1x8x128xf32, #tpu.memory_space<vmem>>, vector<1x8x128xf32>
    %4 = vector.shape_cast %3 : vector<1x8x128xf32> to vector<8x128xf32>
    %c0_3 = arith.constant 0 : index
    %c4 = arith.constant 4 : index
    %5 = vector.load %arg7[%c0_3, %c4] : memref<8x132xf32, #tpu.memory_space<vmem>>, vector<8x128xf32>
    tpu.vector_store %arg7[%c0_3, %c4], %4 {strides = array<i32>} : memref<8x132xf32, #tpu.memory_space<vmem>>, vector<8x128xf32>,
    %c0_4 = arith.constant 0 : index
    %c0_5 = arith.constant 0 : index
    %6 = vector.load %arg7[%c0_4, %c0_5] : memref<8x132xf32, #tpu.memory_space<vmem>>, vector<8x128xf32>
    %c0_6 = arith.constant 0 : index
    %c0_7 = arith.constant 0 : index
    %7 = vector.load %arg8[%c0_6, %c0_7] : memref<24x128xf32, #tpu.memory_space<vmem>>, vector<8x128xf32>
    tpu.vector_store %arg8[%c0_6, %c0_7], %6 {strides = array<i32>} : memref<24x128xf32, #tpu.memory_space<vmem>>, vector<8x128xf32>,
    %c0_8 = arith.constant 0 : index
    %c2 = arith.constant 2 : index
    %8 = vector.load %arg7[%c0_8, %c2] : memref<8x132xf32, #tpu.memory_space<vmem>>, vector<8x128xf32>
    %c8 = arith.constant 8 : index
    %c0_9 = arith.constant 0 : index
    %9 = vector.load %arg8[%c8, %c0_9] : memref<24x128xf32, #tpu.memory_space<vmem>>, vector<8x128xf32>
    tpu.vector_store %arg8[%c8, %c0_9], %8 {strides = array<i32>} : memref<24x128xf32, #tpu.memory_space<vmem>>, vector<8x128xf32>,
    %c0_10 = arith.constant 0 : index
    %c4_11 = arith.constant 4 : index
    %10 = vector.load %arg7[%c0_10, %c4_11] : memref<8x132xf32, #tpu.memory_space<vmem>>, vector<8x128xf32>
    %c16 = arith.constant 16 : index
    %c0_12 = arith.constant 0 : index
    %11 = vector.load %arg8[%c16, %c0_12] : memref<24x128xf32, #tpu.memory_space<vmem>>, vector<8x128xf32>
    tpu.vector_store %arg8[%c16, %c0_12], %10 {strides = array<i32>} : memref<24x128xf32, #tpu.memory_space<vmem>>, vector<8x128xf32>,
    %c0_13 = arith.constant 0 : index
    %c0_14 = arith.constant 0 : index
    %12 = vector.load %arg4[%c0_13, %c0_14] : memref<8x24xf32, #tpu.memory_space<vmem>>, vector<8x24xf32>
    %c0_15 = arith.constant 0 : index
    %c0_16 = arith.constant 0 : index
    %13 = vector.load %arg8[%c0_15, %c0_16] : memref<24x128xf32, #tpu.memory_space<vmem>>, vector<24x128xf32>
    %cst = arith.constant dense<0.000000e+00> : vector<8x128xf32>
    %14 = tpu.matmul %12, %13, %cst {dimension_numbers = #tpu.dot_dimension_numbers<[1], [0], [0], [1], [0, 0, 1, 1], [], []>} : vector<8x24xf32>, vector<24x128xf32>, vector<8x128xf32> -> vector<8x128xf32>
    %c0_17 = arith.constant 0 : index
    %c0_18 = arith.constant 0 : index
    %15 = vector.load %arg5[%c0_17, %c0_18] : memref<8x1xf32, #tpu.memory_space<vmem>>, vector<8x1xf32>
    %16 = vector.broadcast %15 : vector<8x1xf32> to vector<8x128xf32>
    %17 = arith.addf %14, %16 : vector<8x128xf32>
    %c0_19 = arith.constant 0 : index
    %c0_20 = arith.constant 0 : index
    %c0_21 = arith.constant 0 : index
    %18 = vector.load %arg6[%c0_19, %c0_20, %c0_21] : memref<1x8x128xf32, #tpu.memory_space<vmem>>, vector<1x8x128xf32>
    %19 = vector.shape_cast %18 : vector<1x8x128xf32> to vector<8x128xf32>
    %20 = vector.shape_cast %17 : vector<8x128xf32> to vector<1x8x128xf32>
    tpu.vector_store %arg6[%c0_19, %c0_20, %c0_21], %20 {strides = array<i32>} : memref<1x8x128xf32, #tpu.memory_space<vmem>>, vector<1x8x128xf32>,
    %c1_i32 = arith.constant 1 : i32
    %21 = arith.addi %arg2, %c1_i32 : i32
    %c1_i32_22 = arith.constant 1 : i32
    %22 = arith.cmpi slt, %21, %c1_i32_22 : i32
    %23 = arith.extui %22 : i1 to i32
    %c0_i32_23 = arith.constant 0 : i32
    %24 = arith.cmpi ne, %23, %c0_i32_23 : i32
    scf.if %24 {
      %c0_24 = arith.constant 0 : index
      %c128 = arith.constant 128 : index
      %25 = vector.load %arg7[%c0_24, %c128] : memref<8x132xf32, #tpu.memory_space<vmem>>, vector<8x4xf32>
      %c0_25 = arith.constant 0 : index
      %c0_26 = arith.constant 0 : index
      %26 = vector.load %arg7[%c0_25, %c0_26] : memref<8x132xf32, #tpu.memory_space<vmem>>, vector<8x4xf32>
      tpu.vector_store %arg7[%c0_25, %c0_26], %25 {strides = array<i32>} : memref<8x132xf32, #tpu.memory_space<vmem>>, vector<8x4xf32>,
    } else {
    }
    return
  }
  func.func @transform_0(%arg0: i32, %arg1: i32, %arg2: i32) -> (i32, i32, i32) {
    %c0_i32 = arith.constant 0 : i32
    %c0_i32_0 = arith.constant 0 : i32
    return %arg0, %c0_i32, %arg2 : i32, i32, i32
  }
  func.func @transform_1(%arg0: i32, %arg1: i32, %arg2: i32) -> (i32, i32) {
    %c0_i32 = arith.constant 0 : i32
    %c0_i32_0 = arith.constant 0 : i32
    return %arg1, %c0_i32 : i32, i32
  }
  func.func @transform_2(%arg0: i32, %arg1: i32, %arg2: i32) -> (i32, i32) {
    %c0_i32 = arith.constant 0 : i32
    %c0_i32_0 = arith.constant 0 : i32
    return %arg1, %c0_i32 : i32, i32
  }
  func.func @transform_3(%arg0: i32, %arg1: i32, %arg2: i32) -> (i32, i32, i32) {
    %c0_i32 = arith.constant 0 : i32
    return %arg0, %arg1, %arg2 : i32, i32, i32
  }
}

</mosaic_0001>

<bundles_post_ra>
// kernel: tpu_custom_call.1
= control target key start
LH: loop header
LB: loop body
LE: loop exit
PB: predicated region body
PF: predicated region fallthrough
CT: control target
= control target key end

     0   :  { %8 = vsyncpa [#allocation5], 0  ;;  %s827_s0 = inlined_call_operand.hbm [shape: f32[2,8,128], index: 0, kind: input, shape index: {}]   ;;  %s828_s1 = inlined_call_operand.vmem [shape: f32[8,24], index: 1, kind: input, shape index: {}]   ;;  %s829_s2 = inlined_call_operand.vmem [shape: f32[8,1], index: 2, kind: input, shape index: {}]   ;;  %s830_s3 = inlined_call_operand.hbm [shape: f32[2,8,128], index: 3, kind: output, shape index: {}]  }
   0x1   :  { %10 = vsyncpa [#allocation5 + $0x1], 0 }
   0x2   :  { %11 = vsyncpa [#allocation6], 0 }
   0x3   :  { %13 = vsyncpa [#allocation6 + $0x1], 0  ;;  %s697_s12 = smov 0   ;;  %s699_s13 = smov 0  }
   0x4   :  { %s701_s14 = smov 0   ;;  %s703_s15 = smov 0  }
   0x5   :  { %s705_s16 = smov 0   ;;  %s707_s17 = smov 0  }
   0x6 LB: > { %s463_s18 = sadd.s32 4294967295, %s670_s17   ;;  %s464_s19 = sadd.s32 4294967294, %s670_s17   ;;  %s670_s17 = sphi %s707_s17, %s19_s17   ;;  %s666_s16 = sphi %s705_s16, %s839_s16   ;;  %s662_s15 = sphi %s703_s15, %s838_s15   ;;  %s658_s14 = sphi %s701_s14, %s837_s14   ;;  %s654_s13 = sphi %s699_s13, %s836_s13   ;;  %s650_s12 = sphi %s697_s12, %s835_s12  }
   0x7   : > { %s38_s20 = sadd.s32 1, %s666_s16  ;;  %s47_s21 = sadd.s32 1, %s658_s14 }
   0x8   : > { %p40_p0 = scmp.ge.s32.totalorder %s38_s20, 2  ;;  %p54_p1 = scmp.ne.s32.totalorder %s658_s14, %s654_s13 }
   0x9   : > { %p55_p2 = scmp.eq.s32.totalorder %s670_s17, 0  ;;  %p60_p3 = scmp.ne.s32.totalorder %s654_s13, %s650_s12 }
   0xa   : > { %s841_s20 = smov (%p40_p0, %s38_s20), 0  ;;  %p61_p5 = scmp.eq.s32.totalorder %s463_s18, 0 }
   0xb   : > { %p738_p4 = por %p55_p2, %p54_p1  ;;  %s42_s23 = ssub.s32 %s666_s16, %s841_s20 }
   0xc   : > { %p140_p6 = scmp.eq.s32.totalorder %s463_s18, 1  ;;  %p45_p7 = scmp.eq.s32.totalorder %s42_s23, 0 }
   0xd   : > { %p744_p8 = por %p61_p5, %p60_p3  ;;  %p146_p10 = scmp.eq.s32.totalorder %s464_s19, 1 }
   0xe   : > { %p748_p9 = por %p140_p6, %p54_p1  ;;  %p468_p12 = scmp.ge.s32.totalorder %s670_s17, 2 }
   0xf   : > { %s753_s26 = scalar_select %p45_p7, %s658_s14, %s47_s21  }
  0x10   : > { %p755_p11 = por %p146_p10, %p60_p3  ;;  %p491_p13 = scmp.lt.s32.totalorder %s670_s17, 2 }
  0x11   : > { %s180_s28 = sand.u32 1, %s658_s14   ;;  %s470_s30 = sshll.u32 %s666_s16, 3 }
  0x12   : > { %s469_s29 = sshll.u32 %s180_s28, 3  ;;  %s189_s6 = scalar_lea.hbm %s827_s0, %s470_s30 }
  0x13   : > { %s184_s7 = scalar_lea.vmem [#allocation4], %s469_s29  ;;  %s191_s9 = sshll.u32 %s189_s6, 4  ;;  %s192_s9 = int_to_ptr.hbm [resolvable:$true] %s191_s9 }
  0x14   : > { %s193_s8 = sshll.u32 %s184_s7, 4  ;;  %p484_p0 = pnand %p491_p13, %p738_p4  ;;  %s194_s8 = int_to_ptr.vmem [resolvable:$true] %s193_s8 }
  0x15   : > { %p471_p1 = scmp.ge.s32.totalorder %s670_s17, 1  ;;  %p198_p2 = scmp.lt.s32.totalorder %s670_s17, 3 }
  0x16   : > { %s181_s10 = scalar_lea.sflag [#allocation5], %s180_s28 }
  0x17   : > { %486 = dma.hbm_to_vmem [thread:$0]  (!%p484_p0), %s192_s9, 128, %s194_s8, %s181_s10  }
  0x18   : > { %p199_p3 = pnand %p471_p1, %p198_p2 }
  0x19   : > { %s771_s11 = sand.u32 (!%p199_p3), 1, %s654_s13  }
  0x1a   : > { %202 = sbr.rel (%p199_p3) target bundleno = 413 (0x19d), region = 32  ;;  %s472_s18 = sshll.u32 (!%p199_p3), %s771_s11, 3 }
  0x1b   : > { %s205_s19 = scalar_lea.sflag (!%p199_p3), [#allocation5], %s771_s11  ;;  %s208_s21 = scalar_lea.vmem (!%p199_p3), [#allocation4], %s472_s18 }
  0x1f   : > { %641 = dma.done.wait (%p744_p8), %s205_s19, 128  }
  0x20   : > { %643 = vsyncadd (%p744_p8), %s205_s19, 4294967168  ;;  %vm252_vm0 = vcmask 31744   ;;  %v672_v0 = vmov 0.0   ;;  %v254_v1 = vld [vmem:[%s208_s21] sm:$0xff]  ;;  %s673_s22 = smov 4   ;;  %vm259_vm1 = vcmask 1047584  }
  0x21   : > { %253 = vst.msk [vmem:[#allocation2] sm:$0xff] %vm252_vm0, %v672_v0  ;;  %256 = vrot.lane.b32.xlu0 %v254_v1, %s673_s22  ;;  %s674_s23 = smov 124   ;;  %s675_s28 = smov 126   ;;  %v293_v6 = vld [vmem:[%s829_s2] sm:$0xff]  ;;  %v676_v7 = vmov 0   ;;  %vm285_vm2 = vcmask 1014784  }
  0x22   : > { %556 = vset.pattern.permute.xlu1 %v676_v7  ;;  %557 = vset.pattern.permute.xlu0 %v676_v7  ;;  %vm273_vm3 = vcmask 1031168   ;;  %v289_v16 = vld [vmem:[%s828_s1] sm:$0xff]  ;;  %vm299_vm4 = vcmask 195584   ;;  %s476_s5 = sshll.u32 %s662_s15, 3  ;;  %s239_s9 = scalar_lea.vmem [#allocation7], %s472_s18 }
  0x23   : > { %s344_s8 = scalar_lea.hbm %s830_s3, %s476_s5  ;;  %s346_s10 = sshll.u32 %s239_s9, 4  ;;  %s347_s10 = int_to_ptr.vmem [resolvable:$true] %s346_s10 }
  0x24   : > { %s348_s19 = sshll.u32 %s344_s8, 4  ;;  %s332_s21 = scalar_lea.sflag [#allocation6], %s771_s11  ;;  %s349_s19 = int_to_ptr.hbm [resolvable:$true] %s348_s19 }
  0x25   : > { %s602_s22 = sshra.s32 %s349_s19, 4  ;;  %s608_s29 = scalar_lea.hbm %s830_s3, 16  ;;  %s603_s22 = int_to_ptr.hbm [resolvable:$true] %s602_s22 }
  0x26   : > { %p609_p7 = scmp.lt.s32.totalorder %s603_s22, %s830_s3 }
  0x93   : > { %v257_v2 = vpop.permute.xlu0 %256 }
  0x94   : > { %260 = vst.msk [vmem:[#allocation2] sm:$0xff] %vm259_vm1, %v257_v2 }
  0x95   : > { %262 = vst.msk [vmem:[#allocation2 + $0x8] sm:$0xff] %vm252_vm0, %v257_v2 }
  0x9b   : > { %v277_v3 = vld [vmem:[#allocation2] sm:$0xff] }
  0x9c   : > { %v278_v4 = vld [vmem:[#allocation2 + $0x8] sm:$0xff] }
  0x9d   : > { %v546_v5 = vpack.i.bf16 %v278_v4, %v277_v3 }
  0x9f   : > { %547 = vrot.lane.b32.xlu0 %v546_v5, %s674_s23  ;;  %552 = vrot.lane.b32.xlu1 %v546_v5, %s675_s28  ;;  %s604_s23 = scalar_lea.hbm %s603_s22, 8 }
  0xa0   : > { %p605_p4 = scmp.ne.s32.totalorder %s603_s22, %s604_s23  ;;  %p610_p8 = scmp.lt.s32.totalorder %s608_s29, %s604_s23 }
  0xa2   : > { %p606_p5 = pnand %p605_p4, %p748_p9  ;;  %p611_p10 = por %p610_p8, %p609_p7 }
  0xa4   : > { %p607_p6 = pneg %p606_p5 }
  0xa6   : > { %p612_p13 = pnand %p611_p10, %p607_p6 }
  0xa7   : > { %296 = vperm.xlu1 %556, %v293_v6  }
 0x111   : > { %v548_v8 = vpop.permute.xlu0 %547  ;;  %v553_v9 = vpop.permute.xlu1 %552 }
 0x112   : > { %v550_v10 = vunpack.i.h.bf16 %v548_v8  ;;  %v549_v11 = vunpack.i.l.bf16 %v548_v8  ;;  %v555_v12 = vunpack.i.h.bf16 %v553_v9  ;;  %v554_v13 = vunpack.i.l.bf16 %v553_v9 }
 0x114   : > { %v286_v14 = vsel %vm285_vm2, %v549_v11, %v550_v10  ;;  %v274_v15 = vsel %vm273_vm3, %v554_v13, %v555_v12 }
 0x115   : > { %316 = vmatpush.msra.mxu0 %v286_v14 }
 0x117   : > { %317 = vmatpush.msra.mxu0 %v274_v15 }
 0x119   : > { %318 = vmatpush.msra.mxu0 %v277_v3  ;;  %v297_v17 = vpop.permute.xlu1 %296 }
 0x11a   : > { %474 = vmatmul.msk.f32.vlgmr.msra.gmra.mxu0 %vm299_vm4, %v289_v16 }
 0x197   : > { %v320_v18 = vpop.f32.mrf.mxu0 }
 0x198   : > { %v321_v19 = vadd.f32 %v320_v18, %v297_v17 }
 0x19a   : > { %323 = vst [vmem:[%s239_s9] sm:$0xff] %v321_v19 }
 0x19b   : > { %615 = shalt.err (!%p612_p13)
}
 0x19c   : > { %481 = dma.vmem_to_hbm [thread:$0]  (%p748_p9), %s347_s10, 128, %s349_s19, %s332_s21  }
 0x19d PF: > { %s360_s11 = sand.u32 1, %s650_s12   ;;  %p488_p0 = pnand %p468_p12, %p755_p11 }
 0x19e   : > { %s361_s30 = scalar_lea.sflag [#allocation6], %s360_s11 }
 0x19f   : > { %p489_p1 = pneg %p488_p0 }
 0x1a1   : > { %645 = dma.done.wait (%p489_p1), %s361_s30, 128  }
 0x1a2   : > { %647 = vsyncadd (%p489_p1), %s361_s30, 4294967168  ;;  %s19_s17 = sadd.s32 1, %s670_s17   ;;  %s835_s12 = smov %s654_s13 }
 0x1a3   : > { %p16_p2 = scmp.ge.s32.totalorder %s19_s17, 4   ;;  %s836_s13 = smov %s658_s14 }
 0x1a4   : > { %s837_s14 = smov %s753_s26  ;;  %s838_s15 = smov %s666_s16 }
 0x1a5   : > { %s839_s16 = smov %s841_s20  ;;  %18 = sbr.rel (!%p16_p2) target bundleno = 6 (0x6), region = 91 }
 0x1aa   :  { %367 = vsyncpa [#allocation5], 1 }
 0x1ab   :  { %369 = vsyncpa [#allocation5 + $0x1], 1 }
 0x1ac   :  { %370 = vsyncpa [#allocation6], 1 }
 0x1ad   :  { %372 = vsyncpa [#allocation6 + $0x1], 1 }

</bundles_post_ra>
